<compile_context>
chip_gen: v7x
topology: tpu7x:2x2x1
jax: 0.10.0
libtpu: 0.0.40
codegen_flags: <defaults>
</compile_context>

<pallas_src>
import jax
import jax.numpy as jnp
from jax.experimental import pallas as pl
from jax.experimental.pallas import tpu as pltpu


def _dwconv3d_kernel(w_ref, b_ref, x_ref, o_ref):
    # w_ref: (C_out, C_in)  fused (depthwise * pointwise) weight
    # b_ref: (C_out, 1)     fused bias (f32), lane-broadcast over the tile
    # x_ref: (C_in, TS)     spatial tile: channels = MXU K dim, spatial = lanes
    # o_ref: (C_out, TS)    lane-dense output tile, written directly in NCDHW
    acc = jnp.dot(w_ref[...], x_ref[...], preferred_element_type=jnp.float32)
    o_ref[...] = (acc + b_ref[...]).astype(o_ref.dtype)


def dwconv3d(x_ncdhw, w_dw, b_dw, w_pw, b_pw, *, ts=None):
    """DWConv3d forward (kernel_size=1).

    x_ncdhw: (N, C_in, D, H, W)
    PyTorch Conv3d parameter shapes:
      w_dw (C_in, 1, 1, 1, 1), b_dw (C_in,), w_pw (C_out, C_in, 1, 1, 1), b_pw (C_out,)
    """
    N, C_in, D, H, W = x_ncdhw.shape
    C_out = w_pw.shape[0]
    S = D * H * W

    # Flatten spatial axis only — free reshape, keeps NCDHW memory order.
    x = x_ncdhw.reshape(N, C_in, S)

    # --- fold depthwise (k=1: per-channel scale + bias) into pointwise ---
    w_dw_v = w_dw.reshape(C_in).astype(jnp.float32)
    b_dw_v = b_dw.reshape(C_in).astype(jnp.float32)
    w_pw_m = w_pw.reshape(C_out, C_in).astype(jnp.float32)
    b_pw_v = b_pw.reshape(C_out).astype(jnp.float32)

    w_fused = w_pw_m * w_dw_v[None, :]               # (C_out, C_in)
    b_fused = w_pw_m @ b_dw_v + b_pw_v                # (C_out,)

    # bf16 inputs -> bf16 MXU operands (full-rate on v6e/v7x); else f32.
    compute_dtype = jnp.bfloat16 if x.dtype == jnp.bfloat16 else jnp.float32
    w_fused = w_fused.astype(compute_dtype)
    b_fused = b_fused.reshape(C_out, 1).astype(jnp.float32)

    # --- choose spatial tile size (lane-dense, multiple of 128) ---
    itemsize = jnp.dtype(x.dtype).itemsize
    pad8 = lambda c: ((c + 7) // 8) * 8  # sublane padding in VMEM
    if ts is None:
        # Budget ~16 MiB for the double-buffered input+output blocks so we stay
        # well inside the 32 MiB scoped default and v7x's 64 MiB physical VMEM.
        budget = 16 * 1024 * 1024
        ts = budget // max(1, 2 * (pad8(C_in) + pad8(C_out)) * itemsize)
        ts = min(ts, 16384)
    ts = min(ts, ((S + 127) // 128) * 128)   # no bigger than (padded) S
    ts = max(128, (ts // 128) * 128)          # multiple of 128

    grid = (N, pl.cdiv(S, ts))

    cost = pl.CostEstimate(
        flops=2 * N * S * C_in * C_out,
        transcendentals=0,
        bytes_accessed=N * S * (C_in + C_out) * itemsize
        + (C_out * C_in + C_out) * 4,
    )

    out_flat = pl.pallas_call(
        _dwconv3d_kernel,
        out_shape=jax.ShapeDtypeStruct((N, C_out, S), x_ncdhw.dtype),
        grid_spec=pltpu.PrefetchScalarGridSpec(
            num_scalar_prefetch=0,
            grid=grid,
            in_specs=[
                pl.BlockSpec((C_out, C_in), lambda n, s: (0, 0)),   # resident
                pl.BlockSpec((C_out, 1), lambda n, s: (0, 0)),      # resident
                pl.BlockSpec((None, C_in, ts), lambda n, s: (n, 0, s)),
            ],
            out_specs=pl.BlockSpec((None, C_out, ts), lambda n, s: (n, 0, s)),
        ),
        compiler_params=pltpu.CompilerParams(
            dimension_semantics=("parallel", "parallel"),
        ),
        cost_estimate=cost,
    )(w_fused, b_fused, x)

    # Free reshape back to NCDHW (already in the right memory order).
    return out_flat.reshape(N, C_out, D, H, W)


def _reference(x_ncdhw, w_dw, b_dw, w_pw, b_pw):
    # pure-JAX reference of the same math (depthwise k=1 then pointwise 1x1x1)
    C_in = x_ncdhw.shape[1]
    C_out = w_pw.shape[0]
    dw = x_ncdhw * w_dw.reshape(1, C_in, 1, 1, 1) + b_dw.reshape(1, C_in, 1, 1, 1)
    pw = jnp.einsum("ncdhw,oc->nodhw", dw, w_pw.reshape(C_out, C_in))
    return pw + b_pw.reshape(1, C_out, 1, 1, 1)


if __name__ == "__main__":
    # small deterministic example: N=2, C_in=4, C_out=8, D=H=W=8
    N, C_in, C_out, D, H, W = 2, 4, 8, 8, 8, 8
    key = jax.random.PRNGKey(0)
    kx, k1, k2, k3, k4 = jax.random.split(key, 5)

    x = jax.random.normal(kx, (N, C_in, D, H, W), dtype=jnp.float32)
    # nn.Conv3d parameter shapes (values are synthetic / deterministic)
    w_dw = jax.random.normal(k1, (C_in, 1, 1, 1, 1), dtype=jnp.float32) * 0.5
    b_dw = jax.random.normal(k2, (C_in,), dtype=jnp.float32) * 0.1
    w_pw = jax.random.normal(k3, (C_out, C_in, 1, 1, 1), dtype=jnp.float32) * 0.5
    b_pw = jax.random.normal(k4, (C_out,), dtype=jnp.float32) * 0.1

    out = dwconv3d(x, w_dw, b_dw, w_pw, b_pw)
    out = jax.block_until_ready(out)

    ref = _reference(x, w_dw, b_dw, w_pw, b_pw)
    assert out.shape == (N, C_out, D, H, W)
    assert jnp.allclose(out, ref, atol=1e-4, rtol=1e-4)

    print("KERNEL_OK")
</pallas_src>

<mosaic_0001>
module attributes {stable_mosaic.version = 11 : i64} {
  func.func @_dwconv3d_kernel(%arg0: i32, %arg1: i32, %arg2: memref<8x4xf32, #tpu.memory_space<vmem>>, %arg3: memref<8x1xf32, #tpu.memory_space<vmem>>, %arg4: memref<1x4x512xf32, #tpu.memory_space<vmem>>, %arg5: memref<1x8x512xf32, #tpu.memory_space<vmem>>) attributes {dimension_semantics = [#tpu.dimension_semantics<parallel>, #tpu.dimension_semantics<parallel>], iteration_bounds = array<i64: 2, 1>, scalar_prefetch = 0 : i64, scratch_operands = 0 : i64, tpu.core_type = #tpu.core_type<tc>, window_params = [{pipeline_mode = #tpu.pipeline_mode<synchronous>, transform_indices = @transform_0, window_bounds = array<i64: 8, 4>}, {pipeline_mode = #tpu.pipeline_mode<synchronous>, transform_indices = @transform_1, window_bounds = array<i64: 8, 1>}, {transform_indices = @transform_2, window_bounds = array<i64: 1, 4, 512>}, {transform_indices = @transform_3, window_bounds = array<i64: 1, 8, 512>}]} {
    %c0 = arith.constant 0 : index
    %c0_0 = arith.constant 0 : index
    %0 = vector.load %arg2[%c0, %c0_0] : memref<8x4xf32, #tpu.memory_space<vmem>>, vector<8x4xf32>
    %c0_1 = arith.constant 0 : index
    %c0_2 = arith.constant 0 : index
    %c0_3 = arith.constant 0 : index
    %1 = vector.load %arg4[%c0_1, %c0_2, %c0_3] : memref<1x4x512xf32, #tpu.memory_space<vmem>>, vector<1x4x512xf32>
    %2 = vector.shape_cast %1 : vector<1x4x512xf32> to vector<4x512xf32>
    %cst = arith.constant dense<0.000000e+00> : vector<8x512xf32>
    %3 = tpu.matmul %0, %2, %cst {dimension_numbers = #tpu.dot_dimension_numbers<[1], [0], [0], [1], [0, 0, 1, 1], [], []>} : vector<8x4xf32>, vector<4x512xf32>, vector<8x512xf32> -> vector<8x512xf32>
    %c0_4 = arith.constant 0 : index
    %c0_5 = arith.constant 0 : index
    %4 = vector.load %arg3[%c0_4, %c0_5] : memref<8x1xf32, #tpu.memory_space<vmem>>, vector<8x1xf32>
    %5 = vector.broadcast %4 : vector<8x1xf32> to vector<8x512xf32>
    %6 = arith.addf %3, %5 : vector<8x512xf32>
    %c0_6 = arith.constant 0 : index
    %c0_7 = arith.constant 0 : index
    %c0_8 = arith.constant 0 : index
    %7 = vector.load %arg5[%c0_6, %c0_7, %c0_8] : memref<1x8x512xf32, #tpu.memory_space<vmem>>, vector<1x8x512xf32>
    %8 = vector.shape_cast %7 : vector<1x8x512xf32> to vector<8x512xf32>
    %9 = vector.shape_cast %6 : vector<8x512xf32> to vector<1x8x512xf32>
    tpu.vector_store %arg5[%c0_6, %c0_7, %c0_8], %9 {strides = array<i32>} : memref<1x8x512xf32, #tpu.memory_space<vmem>>, vector<1x8x512xf32>,
    return
  }
  func.func @transform_0(%arg0: i32, %arg1: i32) -> (i32, i32) {
    %c0_i32 = arith.constant 0 : i32
    %c0_i32_0 = arith.constant 0 : i32
    %c0_i32_1 = arith.constant 0 : i32
    return %c0_i32, %c0_i32_0 : i32, i32
  }
  func.func @transform_1(%arg0: i32, %arg1: i32) -> (i32, i32) {
    %c0_i32 = arith.constant 0 : i32
    %c0_i32_0 = arith.constant 0 : i32
    %c0_i32_1 = arith.constant 0 : i32
    return %c0_i32, %c0_i32_0 : i32, i32
  }
  func.func @transform_2(%arg0: i32, %arg1: i32) -> (i32, i32, i32) {
    %c0_i32 = arith.constant 0 : i32
    %c0_i32_0 = arith.constant 0 : i32
    return %arg0, %c0_i32, %arg1 : i32, i32, i32
  }
  func.func @transform_3(%arg0: i32, %arg1: i32) -> (i32, i32, i32) {
    %c0_i32 = arith.constant 0 : i32
    %c0_i32_0 = arith.constant 0 : i32
    return %arg0, %c0_i32, %arg1 : i32, i32, i32
  }
}

</mosaic_0001>

<bundles_post_ra>
// kernel: tpu_custom_call.1
= control target key start
LH: loop header
LB: loop body
LE: loop exit
PB: predicated region body
PF: predicated region fallthrough
CT: control target
= control target key end

     0   :  { %8 = vsyncpa [#allocation3], 0  ;;  %s887_s0 = inlined_call_operand.vmem [shape: f32[8,4], index: 0, kind: input, shape index: {}]   ;;  %s888_s1 = inlined_call_operand.vmem [shape: f32[8,1], index: 1, kind: input, shape index: {}]   ;;  %s889_s2 = inlined_call_operand.hbm [shape: f32[2,4,512], index: 2, kind: input, shape index: {}]   ;;  %s890_s3 = inlined_call_operand.hbm [shape: f32[2,8,512], index: 3, kind: output, shape index: {}]  }
   0x1   :  { %10 = vsyncpa [#allocation3 + $0x1], 0 }
   0x2   :  { %11 = vsyncpa [#allocation4], 0 }
   0x3   :  { %13 = vsyncpa [#allocation4 + $0x1], 0  ;;  %s708_s12 = smov 0   ;;  %s710_s13 = smov 0  }
   0x4   :  { %s712_s14 = smov 0   ;;  %s714_s15 = smov 0  }
   0x5   :  { %s716_s16 = smov 0   ;;  %s718_s17 = smov 0  }
   0x6 LB: > { %s480_s18 = sadd.s32 4294967295, %s682_s17   ;;  %s481_s19 = sadd.s32 4294967294, %s682_s17   ;;  %s682_s17 = sphi %s718_s17, %s19_s17   ;;  %s678_s16 = sphi %s716_s16, %s906_s16   ;;  %s674_s15 = sphi %s714_s15, %s905_s15   ;;  %s670_s14 = sphi %s712_s14, %s904_s14   ;;  %s666_s13 = sphi %s710_s13, %s903_s13   ;;  %s662_s12 = sphi %s708_s12, %s902_s12  }
   0x7   : > { %s31_s20 = sadd.s32 1, %s678_s16  ;;  %s82_s21 = sadd.s32 1, %s670_s14 }
   0x8   : > { %p33_p0 = scmp.ge.s32.totalorder %s31_s20, 2  ;;  %p89_p1 = scmp.ne.s32.totalorder %s670_s14, %s666_s13 }
   0x9   : > { %p90_p2 = scmp.eq.s32.totalorder %s682_s17, 0  ;;  %p95_p3 = scmp.ne.s32.totalorder %s666_s13, %s662_s12 }
   0xa   : > { %s908_s20 = smov (%p33_p0, %s31_s20), 0  ;;  %p96_p5 = scmp.eq.s32.totalorder %s480_s18, 0 }
   0xb   : > { %p749_p4 = por %p90_p2, %p89_p1  ;;  %s77_s23 = ssub.s32 %s678_s16, %s908_s20 }
   0xc   : > { %p121_p6 = scmp.eq.s32.totalorder %s480_s18, 1  ;;  %p80_p7 = scmp.eq.s32.totalorder %s77_s23, 0 }
   0xd   : > { %p755_p8 = por %p96_p5, %p95_p3  ;;  %p127_p10 = scmp.eq.s32.totalorder %s481_s19, 1 }
   0xe   : > { %p759_p9 = por %p121_p6, %p89_p1  ;;  %p515_p13 = scmp.lt.s32.totalorder %s682_s17, 2 }
   0xf   : > { %s764_s26 = scalar_select %p80_p7, %s670_s14, %s82_s21  }
  0x10   : > { %s894_s25 = scalar_select %p759_p9, 1, 0 }
  0x11   : > { %p766_p11 = por %p127_p10, %p95_p3  ;;  %s153_s28 = sand.u32 1, %s670_s14  }
  0x12   : > { %s484_s29 = sshll.u32 %s153_s28, 4  ;;  %s501_s30 = sshll.u32 %s678_s16, 8 }
  0x13   : > { %s895_s27 = scalar_select %p766_p11, 1, 0 }
  0x14   : > { %s777_s6 = scalar_lea.hbm %s889_s2, %s501_s30  ;;  %s157_s7 = scalar_lea.vmem [#allocation2], %s484_s29 }
  0x15   : > { %s167_s8 = sshll.u32 %s157_s7, 4  ;;  %p783_p0 = pnand %p515_p13, %p749_p4  ;;  %s779_s8 = int_to_ptr.vmem [resolvable:$true] %s167_s8 }
  0x16   : > { %s154_s10 = scalar_lea.sflag [#allocation3], %s153_s28  ;;  %s570_s11 = scalar_lea.hbm %s777_s6, 256 }
  0x17   : > { %p571_p3 = scmp.ne.s32.totalorder %s777_s6, %s570_s11  ;;  %p572_p5 = pneg %p783_p0 }
  0x18   : > { %s575_s21 = scalar_lea.hbm %s889_s2, 512  ;;  %p576_p4 = scmp.lt.u32.totalorder %s777_s6, %s889_s2 }
  0x19   : > { %p573_p6 = pnand %p572_p5, %p571_p3  ;;  %p577_p10 = scmp.lt.u32.totalorder %s575_s21, %s570_s11 }
  0x1a   : > { %p579_p12 = scmp.lt.u32.totalorder %s570_s11, %s777_s6 }
  0x1b   : > { %p574_p7 = pneg %p573_p6  ;;  %p578_p13 = por %p577_p10, %p576_p4 }
  0x1d   : > { %p580_p1 = por %p579_p12, %p578_p13 }
  0x1f   : > { %p581_p2 = pnand %p580_p1, %p574_p7 }
  0x21   : > { %584 = shalt.err (!%p581_p2)
}
  0x22   : > { %s585_s28 = scalar_lea.vmem %s779_s8, 256  ;;  %s684_s29 = smov [#allocation2]  }
  0x23   : > { %p586_p3 = scmp.ne.s32.totalorder %s779_s8, %s585_s28  ;;  %s590_s30 = sshll.u32 %s684_s29, 4  ;;  %s591_s30 = int_to_ptr.vmem [resolvable:$false] %s590_s30 }
  0x24   : > { %s592_s4 = scalar_lea.vmem %s591_s30, 512  ;;  %p593_p9 = scmp.lt.s32.totalorder %s779_s8, %s591_s30 }
  0x25   : > { %p588_p6 = pnand %p586_p3, %p572_p5  ;;  %p594_p4 = scmp.lt.s32.totalorder %s592_s4, %s585_s28 }
  0x27   : > { %p589_p11 = pneg %p588_p6  ;;  %p595_p10 = por %p594_p4, %p593_p9 }
  0x29   : > { %p596_p12 = pnand %p595_p10, %p589_p11 }
  0x2b   : > { %599 = shalt.err (!%p596_p12)
}
  0x2c   : > { %510 = dma.hbm_to_vmem [thread:$0]  (!%p783_p0), %s777_s6, 256, %s779_s8, %s154_s10  }
  0x2d   : > { %p897_p1 = scmp.lt.s32.totalorder %s682_s17, 3  ;;  %p898_p2 = scmp.ge.s32.totalorder %s682_s17, 1 }
  0x2f   : > { %p173_p5 = pnand %p898_p2, %p897_p1 }
  0x30   : > { %s819_s5 = sand.u32 (!%p173_p5), 1, %s666_s13  }
  0x31   : > { %176 = sbr.rel (%p173_p5) target bundleno = 292 (0x124), region = 32  ;;  %s488_s7 = sshll.u32 (!%p173_p5), %s819_s5, 4 }
  0x32   : > { %s179_s11 = scalar_lea.sflag (!%p173_p5), [#allocation3], %s819_s5  ;;  %s182_s18 = scalar_lea.vmem (!%p173_p5), [#allocation2], %s488_s7 }
  0x38   : > { %653 = dma.done.wait (%p755_p8), %s179_s11, 256  }
  0x39   : > { %655 = vsyncadd (%p755_p8), %s179_s11, 4294967040  ;;  %v685_v0 = vmov 0.0   ;;  %v686_v1 = vmov 0   ;;  %v208_v2 = vld [vmem:[%s182_s18] sm:$0xff]  ;;  %vm224_vm0 = vcmask 1043456   ;;  %v209_v3 = vld [vmem:[%s182_s18 + $0x8] sm:$0xff] }
  0x3a   : > { %297 = vmatprep.mubr.f32.mxu0 %v685_v0  ;;  %368 = vmatprep.mubr.f32.mxu1 %v685_v0  ;;  %v218_v4 = vcombine.high %v208_v2, %v208_v2  ;;  %v219_v5 = vcombine.high %v209_v3, %v209_v3  ;;  %v210_v6 = vld [vmem:[%s888_s1] sm:$0xff]  ;;  %vm220_vm1 = vcmask 31744   ;;  %s489_s24 = sshll.u32 %s819_s5, 5  ;;  %s502_s19 = sshll.u32 %s674_s15, 9 }
  0x3b   : > { %567 = vset.pattern.permute.xlu0 %v686_v1  ;;  %v207_v7 = vld [vmem:[%s887_s0] sm:$0xff]  ;;  %s204_s21 = scalar_lea.vmem [#allocation5], %s489_s24  ;;  %s838_s29 = scalar_lea.hbm %s890_s3, %s502_s19 }
  0x3c   : > { %213 = vperm.xlu0 %567, %v210_v6   ;;  %490 = vmatprep.subr.msk.mxu0 %vm224_vm0, %v218_v4  ;;  %s396_s22 = sshll.u32 %s204_s21, 4  ;;  %s380_s15 = scalar_lea.sflag [#allocation4], %s819_s5  ;;  %s840_s22 = int_to_ptr.vmem [resolvable:$true] %s396_s22 }
  0x3d   : > { %493 = vmatprep.subr.msk.mxu1 %vm224_vm0, %v219_v5  ;;  %491 = vmatpush1.msk.msra.mxu0 %vm224_vm0, %v208_v2  ;;  %s600_s30 = scalar_lea.vmem %s840_s22, 512  ;;  %p899_p9 = scmp.ne.s32.totalorder %s894_s25, 0 }
  0x3e   : > { %494 = vmatpush1.msk.msra.mxu1 %vm224_vm0, %v209_v3  ;;  %492 = vmatmul.mubr.msk.f32.vlgmr.msra.gmra.mrb[0].mxu0 %vm220_vm1, %v207_v7  ;;  %p601_p8 = scmp.ne.s32.totalorder %s840_s22, %s600_s30  ;;  %s687_s4 = smov [#allocation5]  }
  0x3f   : > { %495 = vmatmul.mubr.msk.f32.vlgmr.msra.gmra.mrb[0].mxu1 %vm220_vm1, %v207_v7  ;;  %s604_s7 = sshll.u32 %s687_s4, 4  ;;  %s605_s7 = int_to_ptr.vmem [resolvable:$false] %s604_s7 }
  0x40   : > { %p602_p11 = pnand %p601_p8, %p899_p9  ;;  %s606_s11 = scalar_lea.vmem %s605_s7, 1024 }
  0x41   : > { %p607_p7 = scmp.lt.s32.totalorder %s840_s22, %s605_s7  ;;  %p608_p13 = scmp.lt.s32.totalorder %s606_s11, %s600_s30 }
  0x42   : > { %p603_p0 = pneg %p602_p11 }
  0x43   : > { %p609_p3 = por %p608_p13, %p607_p7 }
  0x45   : > { %p610_p6 = pnand %p609_p3, %p603_p0 }
  0xbb   : > { %v214_v8 = vpop.permute.xlu0 %213 }
 0x111   : > { %v299_v9 = vpop.f32.mrb[0].mxu0 }
 0x112   : > { %v370_v10 = vpop.f32.mrb[0].mxu1  ;;  %v300_v11 = vadd.f32 %v299_v9, %v214_v8  ;;  %v301_v13 = vpop.f32.mrb[1].mxu0 }
 0x113   : > { %v371_v12 = vadd.f32 %v370_v10, %v214_v8  ;;  %v372_v14 = vpop.f32.mrb[1].mxu1  ;;  %v302_v15 = vadd.f32 %v301_v13, %v214_v8 }
 0x114   : > { %v373_v16 = vadd.f32 %v372_v14, %v214_v8  ;;  %375 = vst [vmem:[%s204_s21] sm:$0xff] %v300_v11 }
 0x115   : > { %377 = vst [vmem:[%s204_s21 + $0x10] sm:$0xff] %v371_v12  ;;  %376 = vst [vmem:[%s204_s21 + $0x8] sm:$0xff] %v302_v15 }
 0x116   : > { %378 = vst [vmem:[%s204_s21 + $0x18] sm:$0xff] %v373_v16 }
 0x117   : > { %613 = shalt.err (!%p610_p6)
}
 0x118   : > { %s614_s5 = scalar_lea.hbm %s838_s29, 512  ;;  %s618_s8 = scalar_lea.hbm %s890_s3, 1024 }
 0x119   : > { %p615_p4 = scmp.ne.s32.totalorder %s838_s29, %s614_s5  ;;  %p619_p1 = scmp.lt.u32.totalorder %s838_s29, %s890_s3 }
 0x11a   : > { %p620_p2 = scmp.lt.u32.totalorder %s618_s8, %s614_s5  ;;  %p622_p8 = scmp.lt.u32.totalorder %s614_s5, %s838_s29 }
 0x11b   : > { %p616_p10 = pnand %p615_p4, %p899_p9 }
 0x11c   : > { %p621_p5 = por %p620_p2, %p619_p1 }
 0x11d   : > { %p617_p12 = pneg %p616_p10 }
 0x11e   : > { %p623_p11 = por %p622_p8, %p621_p5 }
 0x120   : > { %p624_p0 = pnand %p623_p11, %p617_p12 }
 0x122   : > { %627 = shalt.err (!%p624_p0)
}
 0x123   : > { %505 = dma.vmem_to_hbm [thread:$0]  (%p899_p9), %s840_s22, 512, %s838_s29, %s380_s15  }
 0x124 PF: > { %s408_s24 = sand.u32 1, %s662_s12   ;;  %p900_p7 = scmp.ne.s32.totalorder %s895_s27, 0 }
 0x125   : > { %p901_p13 = scmp.ge.s32.totalorder %s682_s17, 2  ;;  %s409_s19 = scalar_lea.sflag [#allocation4], %s408_s24 }
 0x127   : > { %p512_p3 = pnand %p901_p13, %p900_p7 }
 0x129   : > { %657 = dma.done.wait (!%p512_p3), %s409_s19, 512  }
 0x12a   : > { %659 = vsyncadd (!%p512_p3), %s409_s19, 4294966784  ;;  %s19_s17 = sadd.s32 1, %s682_s17   ;;  %s902_s12 = smov %s666_s13 }
 0x12b   : > { %p16_p6 = scmp.ge.s32.totalorder %s19_s17, 4   ;;  %s903_s13 = smov %s670_s14 }
 0x12c   : > { %s904_s14 = smov %s764_s26  ;;  %s905_s15 = smov %s678_s16 }
 0x12d   : > { %s906_s16 = smov %s908_s20  ;;  %18 = sbr.rel (!%p16_p6) target bundleno = 6 (0x6), region = 77 }
 0x134   :  { %414 = vsyncpa [#allocation3], 1 }
 0x135   :  { %416 = vsyncpa [#allocation3 + $0x1], 1 }
 0x136   :  { %417 = vsyncpa [#allocation4], 1 }
 0x137   :  { %419 = vsyncpa [#allocation4 + $0x1], 1 }

</bundles_post_ra>
